<compile_context>
chip_gen: v6e
topology: v6e:2x2x1
jax: 0.10.0
libtpu: 0.0.40
codegen_flags: <defaults>
</compile_context>

<pallas_src>
import jax
import jax.numpy as jnp
from jax.experimental import pallas as pl
from jax.experimental.pallas import tpu as pltpu


_MAX_LANE = 512                      # widest lane-dense last dim tried (multiple of 128)
_TARGET_BLOCK_ELEMS = 1024 * 512     # ~2 MiB f32 input block; ~22 MiB live double-buffered
# Pallas path only when it gets >= 2 pipelined grid steps (also ensures both TCs get work on v7x).
_PALLAS_MIN_ELEMENTS = 2 * _TARGET_BLOCK_ELEMS


def _elementwise_kernel(x_ref,
                        add_ref, sub_ref, mul_ref, div_ref,
                        gt_ref, lt_ref):
    x = x_ref[...]
    add_ref[...] = x + 5.0
    sub_ref[...] = x - 3.0
    mul_ref[...] = x * 2.0
    div_ref[...] = x * 0.25          # bit-exact x / 4 for float inputs (power-of-two divisor)
    gt_ref[...] = x > 1.0            # bool emitted directly from the kernel
    lt_ref[...] = x < 10.0


def _jnp_forward(x):
    """Fused XLA path: tiny tensors, or integer dtypes (torch.div promotes ints to float)."""
    return {
        "add": x + 5,
        "subtract": x - 3,
        "multiply": x * 2,
        "divide": x / 4.0,
        "greater_than": x > 1,
        "less_than": x < 10,
    }


def _pallas_forward(x):
    shape = x.shape
    n = x.size
    dtype = x.dtype

    # Pick the widest lane width that divides the element count -> zero-copy 2D view.
    lane = None
    for cand in (_MAX_LANE, 256, 128):
        if n % cand == 0:
            lane = cand
            break

    flat = x.reshape(-1)
    padded_n = n
    if lane is None:
        # Rare path: only pad the sub-128 lane remainder (not up to a full block).
        lane = 128
        padded_n = ((n + lane - 1) // lane) * lane
        flat = jnp.pad(flat, (0, padded_n - n))

    rows = padded_n // lane
    x2d = flat.reshape(rows, lane)

    # Block rows: target a constant ~2 MiB f32 input block.  The target is a multiple of 32
    # (packed 1-byte stores for the bool outputs); if the whole array fits in one block we
    # use the exact row count (block dim == full array dim is always legal).
    block_rows = min(_TARGET_BLOCK_ELEMS // lane, rows)

    grid = (pl.cdiv(rows, block_rows),)   # ragged last block handled by Pallas masking
    spec = pl.BlockSpec((block_rows, lane), lambda i: (i, 0))

    out_shapes = (
        jax.ShapeDtypeStruct((rows, lane), dtype),    # add
        jax.ShapeDtypeStruct((rows, lane), dtype),    # subtract
        jax.ShapeDtypeStruct((rows, lane), dtype),    # multiply
        jax.ShapeDtypeStruct((rows, lane), dtype),    # divide
        jax.ShapeDtypeStruct((rows, lane), jnp.bool_),  # greater_than
        jax.ShapeDtypeStruct((rows, lane), jnp.bool_),  # less_than
    )

    itemsize = jnp.dtype(dtype).itemsize
    n_pad = rows * lane
    cost = pl.CostEstimate(
        flops=6 * n_pad,
        transcendentals=0,
        bytes_accessed=n_pad * (5 * itemsize + 2),   # 1 in + 4 f32 outs + 2 bool outs
    )

    add, sub, mul, div, gt, lt = pl.pallas_call(
        _elementwise_kernel,
        out_shape=out_shapes,
        grid=grid,
        in_specs=[spec],
        out_specs=(spec,) * 6,
        compiler_params=pltpu.CompilerParams(
            dimension_semantics=("parallel",)),       # megacore sharding on v7x
        cost_estimate=cost,
    )(x2d)

    if padded_n == n:
        def _to_orig(a):
            return a.reshape(shape)
    else:
        def _to_orig(a):
            return a.reshape(-1)[:n].reshape(shape)

    return {
        "add": _to_orig(add),
        "subtract": _to_orig(sub),
        "multiply": _to_orig(mul),
        "divide": _to_orig(div),
        "greater_than": _to_orig(gt),
        "less_than": _to_orig(lt),
    }


def pt_module_forward(x, *, force_pallas=False):
    """Pallas implementation of PtModule.forward. Returns a dict of results."""
    if not jnp.issubdtype(x.dtype, jnp.floating):
        # torch.div promotes integer inputs to float; keep those semantics via the XLA path.
        return _jnp_forward(x)
    if not force_pallas and x.size < _PALLAS_MIN_ELEMENTS:
        return _jnp_forward(x)
    return _pallas_forward(x)


def _reference(x):
    return {
        "add": x + 5.0,
        "subtract": x - 3.0,
        "multiply": x * 2.0,
        "divide": x / 4.0,
        "greater_than": x > 1.0,
        "less_than": x < 10.0,
    }


def _check(results, ref):
    for k in ref:
        assert results[k].dtype == ref[k].dtype, k
        assert results[k].shape == ref[k].shape, k
        if ref[k].dtype == jnp.bool_:
            assert bool(jnp.array_equal(results[k], ref[k])), k
        else:
            assert bool(jnp.allclose(results[k], ref[k])), k


if __name__ == "__main__":
    key = jax.random.PRNGKey(0)
    k1, k2, k3 = jax.random.split(key, 3)

    # Primary demo shape from the module spec: force the Pallas kernel (zero-copy lane=512 view).
    x = jax.random.normal(k1, (2, 4, 16, 16), dtype=jnp.float32) * 5.0
    res_pallas = pt_module_forward(x, force_pallas=True)
    jax.block_until_ready(res_pallas)
    _check(res_pallas, _reference(x))

    # Default dispatch on the tiny shape takes the fused-XLA fast path.
    res_default = pt_module_forward(x)
    jax.block_until_ready(res_default)
    _check(res_default, _reference(x))

    # Element count not a multiple of 128 -> exercises the rare lane-remainder pad path.
    x_odd = jax.random.normal(k2, (2, 3, 17, 19), dtype=jnp.float32) * 5.0
    res_odd = pt_module_forward(x_odd, force_pallas=True)
    jax.block_until_ready(res_odd)
    _check(res_odd, _reference(x_odd))

    # Moderate input: default dispatch takes the Pallas path with 2 pipelined/parallel grid blocks.
    x_big = jax.random.normal(k3, (8, 8, 128, 128), dtype=jnp.float32) * 5.0
    res_big = pt_module_forward(x_big)
    jax.block_until_ready(res_big)
    _check(res_big, _reference(x_big))

    print("KERNEL_OK")
</pallas_src>

<mosaic_0001>
module attributes {stable_mosaic.version = 11 : i64} {
  func.func @_elementwise_kernel(%arg0: i32, %arg1: memref<4x512xf32, #tpu.memory_space<vmem>>, %arg2: memref<4x512xf32, #tpu.memory_space<vmem>>, %arg3: memref<4x512xf32, #tpu.memory_space<vmem>>, %arg4: memref<4x512xf32, #tpu.memory_space<vmem>>, %arg5: memref<4x512xf32, #tpu.memory_space<vmem>>, %arg6: memref<4x512xi32, #tpu.memory_space<vmem>>, %arg7: memref<4x512xi32, #tpu.memory_space<vmem>>) attributes {dimension_semantics = [#tpu.dimension_semantics<parallel>], iteration_bounds = array<i64: 1>, scalar_prefetch = 0 : i64, scratch_operands = 0 : i64, tpu.core_type = #tpu.core_type<tc>, window_params = [{transform_indices = @transform_0, window_bounds = array<i64: 4, 512>}, {transform_indices = @transform_1, window_bounds = array<i64: 4, 512>}, {transform_indices = @transform_2, window_bounds = array<i64: 4, 512>}, {transform_indices = @transform_3, window_bounds = array<i64: 4, 512>}, {transform_indices = @transform_4, window_bounds = array<i64: 4, 512>}, {transform_indices = @transform_5, window_bounds = array<i64: 4, 512>}, {transform_indices = @transform_6, window_bounds = array<i64: 4, 512>}]} {
    %c0 = arith.constant 0 : index
    %c0_0 = arith.constant 0 : index
    %0 = vector.load %arg1[%c0, %c0_0] : memref<4x512xf32, #tpu.memory_space<vmem>>, vector<4x512xf32>
    %cst = arith.constant 5.000000e+00 : f32
    %1 = vector.broadcast %cst : f32 to vector<4x512xf32>
    %2 = arith.addf %0, %1 : vector<4x512xf32>
    %c0_1 = arith.constant 0 : index
    %c0_2 = arith.constant 0 : index
    %3 = vector.load %arg2[%c0_1, %c0_2] : memref<4x512xf32, #tpu.memory_space<vmem>>, vector<4x512xf32>
    tpu.vector_store %arg2[%c0_1, %c0_2], %2 {strides = array<i32>} : memref<4x512xf32, #tpu.memory_space<vmem>>, vector<4x512xf32>,
    %cst_3 = arith.constant 3.000000e+00 : f32
    %4 = vector.broadcast %cst_3 : f32 to vector<4x512xf32>
    %5 = arith.subf %0, %4 : vector<4x512xf32>
    %c0_4 = arith.constant 0 : index
    %c0_5 = arith.constant 0 : index
    %6 = vector.load %arg3[%c0_4, %c0_5] : memref<4x512xf32, #tpu.memory_space<vmem>>, vector<4x512xf32>
    tpu.vector_store %arg3[%c0_4, %c0_5], %5 {strides = array<i32>} : memref<4x512xf32, #tpu.memory_space<vmem>>, vector<4x512xf32>,
    %cst_6 = arith.constant 2.000000e+00 : f32
    %7 = vector.broadcast %cst_6 : f32 to vector<4x512xf32>
    %8 = arith.mulf %0, %7 : vector<4x512xf32>
    %c0_7 = arith.constant 0 : index
    %c0_8 = arith.constant 0 : index
    %9 = vector.load %arg4[%c0_7, %c0_8] : memref<4x512xf32, #tpu.memory_space<vmem>>, vector<4x512xf32>
    tpu.vector_store %arg4[%c0_7, %c0_8], %8 {strides = array<i32>} : memref<4x512xf32, #tpu.memory_space<vmem>>, vector<4x512xf32>,
    %cst_9 = arith.constant 2.500000e-01 : f32
    %10 = vector.broadcast %cst_9 : f32 to vector<4x512xf32>
    %11 = arith.mulf %0, %10 : vector<4x512xf32>
    %c0_10 = arith.constant 0 : index
    %c0_11 = arith.constant 0 : index
    %12 = vector.load %arg5[%c0_10, %c0_11] : memref<4x512xf32, #tpu.memory_space<vmem>>, vector<4x512xf32>
    tpu.vector_store %arg5[%c0_10, %c0_11], %11 {strides = array<i32>} : memref<4x512xf32, #tpu.memory_space<vmem>>, vector<4x512xf32>,
    %cst_12 = arith.constant 1.000000e+00 : f32
    %13 = vector.broadcast %cst_12 : f32 to vector<4x512xf32>
    %14 = arith.cmpf ogt, %0, %13 : vector<4x512xf32>
    %c0_13 = arith.constant 0 : index
    %c0_14 = arith.constant 0 : index
    %15 = vector.load %arg6[%c0_13, %c0_14] : memref<4x512xi32, #tpu.memory_space<vmem>>, vector<4x512xi32>
    %16 = arith.extui %14 : vector<4x512xi1> to vector<4x512xi32>
    %cst_15 = arith.constant dense<0> : vector<4x512xi32>
    %17 = arith.cmpi ne, %15, %cst_15 : vector<4x512xi32>
    tpu.vector_store %arg6[%c0_13, %c0_14], %16 {strides = array<i32>} : memref<4x512xi32, #tpu.memory_space<vmem>>, vector<4x512xi32>,
    %cst_16 = arith.constant 1.000000e+01 : f32
    %18 = vector.broadcast %cst_16 : f32 to vector<4x512xf32>
    %19 = arith.cmpf olt, %0, %18 : vector<4x512xf32>
    %c0_17 = arith.constant 0 : index
    %c0_18 = arith.constant 0 : index
    %20 = vector.load %arg7[%c0_17, %c0_18] : memref<4x512xi32, #tpu.memory_space<vmem>>, vector<4x512xi32>
    %21 = arith.extui %19 : vector<4x512xi1> to vector<4x512xi32>
    %cst_19 = arith.constant dense<0> : vector<4x512xi32>
    %22 = arith.cmpi ne, %20, %cst_19 : vector<4x512xi32>
    tpu.vector_store %arg7[%c0_17, %c0_18], %21 {strides = array<i32>} : memref<4x512xi32, #tpu.memory_space<vmem>>, vector<4x512xi32>,
    return
  }
  func.func @transform_0(%arg0: i32) -> (i32, i32) {
    %c0_i32 = arith.constant 0 : i32
    %c0_i32_0 = arith.constant 0 : i32
    return %arg0, %c0_i32 : i32, i32
  }
  func.func @transform_1(%arg0: i32) -> (i32, i32) {
    %c0_i32 = arith.constant 0 : i32
    %c0_i32_0 = arith.constant 0 : i32
    return %arg0, %c0_i32 : i32, i32
  }
  func.func @transform_2(%arg0: i32) -> (i32, i32) {
    %c0_i32 = arith.constant 0 : i32
    %c0_i32_0 = arith.constant 0 : i32
    return %arg0, %c0_i32 : i32, i32
  }
  func.func @transform_3(%arg0: i32) -> (i32, i32) {
    %c0_i32 = arith.constant 0 : i32
    %c0_i32_0 = arith.constant 0 : i32
    return %arg0, %c0_i32 : i32, i32
  }
  func.func @transform_4(%arg0: i32) -> (i32, i32) {
    %c0_i32 = arith.constant 0 : i32
    %c0_i32_0 = arith.constant 0 : i32
    return %arg0, %c0_i32 : i32, i32
  }
  func.func @transform_5(%arg0: i32) -> (i32, i32) {
    %c0_i32 = arith.constant 0 : i32
    %c0_i32_0 = arith.constant 0 : i32
    return %arg0, %c0_i32 : i32, i32
  }
  func.func @transform_6(%arg0: i32) -> (i32, i32) {
    %c0_i32 = arith.constant 0 : i32
    %c0_i32_0 = arith.constant 0 : i32
    return %arg0, %c0_i32 : i32, i32
  }
}

</mosaic_0001>

<bundles_post_ra>
// kernel: tpu_custom_call.1
= control target key start
LH: loop header
LB: loop body
LE: loop exit
PB: predicated region body
PF: predicated region fallthrough
CT: control target
= control target key end

     0   :  { %12 = vsyncpa [#allocation3], 0  ;;  %s332_s0 = inlined_call_operand.hbm [shape: f32[4,512], index: 0, kind: input, shape index: {}]   ;;  %s333_s1 = inlined_call_operand.hbm [shape: f32[4,512], index: 1, kind: output, shape index: {0}]   ;;  %s334_s2 = inlined_call_operand.hbm [shape: f32[4,512], index: 2, kind: output, shape index: {1}]   ;;  %s335_s3 = inlined_call_operand.hbm [shape: f32[4,512], index: 3, kind: output, shape index: {2}]   ;;  %s336_s4 = inlined_call_operand.hbm [shape: f32[4,512], index: 4, kind: output, shape index: {3}]   ;;  %s337_s5 = inlined_call_operand.vmem [shape: s32[4,512], index: 5, kind: output, shape index: {4}]   ;;  %s338_s6 = inlined_call_operand.vmem [shape: s32[4,512], index: 6, kind: output, shape index: {5}]  }
   0x1   :  { %13 = vsyncpa [#allocation4], 0 }
   0x2   :  { %14 = vsyncpa [#allocation7], 0 }
   0x3   :  { %15 = vsyncpa [#allocation10], 0  ;;  %s239_s21 = smov [#allocation2]  }
   0x4   :  { %s22_s22 = sshll.u32 %s239_s21, 4  ;;  %s23_s22 = int_to_ptr.vmem [resolvable:$true] %s22_s22 }
   0x5   :  { %s139_s23 = scalar_lea.vmem %s23_s22, 256  ;;  %p144_p1 = scmp.lt.s32.totalorder %s23_s22, %s23_s22 }
   0x6   :  { %p140_p0 = scmp.ne.s32.totalorder %s23_s22, %s139_s23  ;;  %p145_p2 = scmp.lt.s32.totalorder %s139_s23, %s139_s23 }
   0x8   :  { %p146_p3 = por %p145_p2, %p144_p1 }
   0xa   :  { %p147_p4 = pnand %p146_p3, %p140_p0 }
   0xc   :  { %150 = shalt.err (!%p147_p4)
}
   0xd   :  { %25 = dma.hbm_to_vmem [thread:$0]  %s332_s0, 256, %s23_s22, [#allocation3]  }
   0xe   :  { %231 = dma.done.wait [#allocation3], 256  }
   0xf   :  { %232 = vsyncadd [#allocation3], 4294967040  ;;  %s240_s26 = smov [#allocation6]   ;;  %s241_s28 = smov [#allocation5]   ;;  %v29_v0 = vld [vmem:[#allocation2] sm:$0xff]  ;;  %v30_v1 = vld [vmem:[#allocation2 + $0x8] sm:$0xff] }
  0x10   :  { %s75_s27 = sshll.u32 %s240_s26, 4  ;;  %s65_s29 = sshll.u32 %s241_s28, 4  ;;  %v123_v2 = vadd.f32 -3.0, %v29_v0  ;;  %v124_v3 = vadd.f32 -3.0, %v30_v1  ;;  %v31_v4 = vadd.f32 5.0, %v29_v0  ;;  %v32_v5 = vadd.f32 5.0, %v30_v1  ;;  %s76_s27 = int_to_ptr.vmem [resolvable:$true] %s75_s27  ;;  %s283_s29 = int_to_ptr.vmem [resolvable:$true] %s65_s29 }
  0x11   :  { %s242_s30 = smov [#allocation8]   ;;  %s243_s8 = smov [#allocation9]   ;;  %v39_v6 = vmul.f32 2.0, %v29_v0  ;;  %v40_v7 = vmul.f32 2.0, %v30_v1  ;;  %v43_v8 = vmul.f32 0.25, %v29_v0  ;;  %v44_v9 = vmul.f32 0.25, %v30_v1 }
  0x12   :  { %s85_s7 = sshll.u32 %s242_s30, 4  ;;  %s95_s9 = sshll.u32 %s243_s8, 4  ;;  %37 = vst [vmem:[#allocation6] sm:$0xff] %v123_v2  ;;  %38 = vst [vmem:[#allocation6 + $0x8] sm:$0xff] %v124_v3  ;;  %vm47_vm0 = vcmp.gt.f32.partialorder %v29_v0, 1.0  ;;  %vm48_vm1 = vcmp.gt.f32.partialorder %v30_v1, 1.0  ;;  %s285_s7 = int_to_ptr.vmem [resolvable:$true] %s85_s7  ;;  %s287_s9 = int_to_ptr.vmem [resolvable:$true] %s95_s9 }
  0x13   :  { %33 = vst [vmem:[#allocation5] sm:$0xff] %v31_v4  ;;  %34 = vst [vmem:[#allocation5 + $0x8] sm:$0xff] %v32_v5  ;;  %vm53_vm2 = vcmp.lt.f32.partialorder %v29_v0, 10.0  ;;  %vm54_vm3 = vcmp.lt.f32.partialorder %v30_v1, 10.0  ;;  %s151_s0 = scalar_lea.vmem %s76_s27, 256  ;;  %p156_p6 = scmp.lt.s32.totalorder %s76_s27, %s76_s27 }
  0x14   :  { %41 = vst [vmem:[#allocation8] sm:$0xff] %v39_v6  ;;  %42 = vst [vmem:[#allocation8 + $0x8] sm:$0xff] %v40_v7  ;;  %p152_p5 = scmp.ne.s32.totalorder %s76_s27, %s151_s0  ;;  %p157_p7 = scmp.lt.s32.totalorder %s151_s0, %s151_s0 }
  0x15   :  { %45 = vst [vmem:[#allocation9] sm:$0xff] %v43_v8  ;;  %46 = vst [vmem:[#allocation9 + $0x8] sm:$0xff] %v44_v9 }
  0x16   :  { %p158_p8 = por %p157_p7, %p156_p6 }
  0x18   :  { %p159_p9 = pnand %p158_p8, %p152_p5 }
  0x1a   :  { %162 = shalt.err (!%p159_p9)
}
  0x1b   :  { %78 = dma.vmem_to_hbm [thread:$0]  %s76_s27, 256, %s334_s2, [#allocation7]   ;;  %v244_v10 = vmov 0  }
  0x1c   :  { %v49_v11 = vsel %vm47_vm0, 1, %v244_v10  ;;  %v50_v12 = vsel %vm48_vm1, 1, %v244_v10  ;;  %v55_v13 = vsel %vm53_vm2, 1, %v244_v10  ;;  %v56_v14 = vsel %vm54_vm3, 1, %v244_v10  ;;  %s171_s19 = scalar_lea.vmem %s283_s29, 256  ;;  %p176_p11 = scmp.lt.s32.totalorder %s283_s29, %s283_s29 }
  0x1d   :  { %51 = vst [vmem:[%s337_s5] sm:$0xff] %v49_v11  ;;  %52 = vst [vmem:[%s337_s5 + $0x8] sm:$0xff] %v50_v12  ;;  %p172_p10 = scmp.ne.s32.totalorder %s283_s29, %s171_s19  ;;  %p177_p12 = scmp.lt.s32.totalorder %s171_s19, %s171_s19 }
  0x1e   :  { %57 = vst [vmem:[%s338_s6] sm:$0xff] %v55_v13  ;;  %58 = vst [vmem:[%s338_s6 + $0x8] sm:$0xff] %v56_v14 }
  0x1f   :  { %p178_p13 = por %p177_p12, %p176_p11 }
  0x21   :  { %p179_p0 = pnand %p178_p13, %p172_p10 }
  0x23   :  { %182 = shalt.err (!%p179_p0)
}
  0x24   :  { %68 = dma.vmem_to_hbm [thread:$0]  %s283_s29, 256, %s333_s1, [#allocation4]  }
  0x25   :  { %s191_s5 = scalar_lea.vmem %s285_s7, 256  ;;  %p196_p2 = scmp.lt.s32.totalorder %s285_s7, %s285_s7 }
  0x26   :  { %p192_p1 = scmp.ne.s32.totalorder %s285_s7, %s191_s5  ;;  %p197_p3 = scmp.lt.s32.totalorder %s191_s5, %s191_s5 }
  0x28   :  { %p198_p4 = por %p197_p3, %p196_p2 }
  0x2a   :  { %p199_p5 = pnand %p198_p4, %p192_p1 }
  0x2c   :  { %202 = shalt.err (!%p199_p5)
}
  0x2d   :  { %88 = dma.vmem_to_hbm [thread:$0]  %s285_s7, 256, %s335_s3, [#allocation7]  }
  0x2e   :  { %s211_s23 = scalar_lea.vmem %s287_s9, 256  ;;  %p216_p7 = scmp.lt.s32.totalorder %s287_s9, %s287_s9 }
  0x2f   :  { %p212_p6 = scmp.ne.s32.totalorder %s287_s9, %s211_s23  ;;  %p217_p8 = scmp.lt.s32.totalorder %s211_s23, %s211_s23 }
  0x31   :  { %p218_p9 = por %p217_p8, %p216_p7 }
  0x33   :  { %p219_p10 = pnand %p218_p9, %p212_p6 }
  0x35   :  { %222 = shalt.err (!%p219_p10)
}
  0x36   :  { %98 = dma.vmem_to_hbm [thread:$0]  %s287_s9, 256, %s336_s4, [#allocation10]  }
  0x37   :  { %233 = dma.done.wait [#allocation4], 256  }
  0x38   :  { %234 = vsyncadd [#allocation4], 4294967040 }
  0x39   :  { %235 = dma.done.wait [#allocation7], 512  }
  0x3a   :  { %236 = vsyncadd [#allocation7], 4294966784 }
  0x3b   :  { %237 = dma.done.wait [#allocation10], 256  }
  0x3c   :  { %238 = vsyncadd [#allocation10], 4294967040 }
  0x3d   :  { %119 = vsyncpa [#allocation3], 1 }
  0x3e   :  { %120 = vsyncpa [#allocation4], 1 }
  0x3f   :  { %121 = vsyncpa [#allocation7], 1 }
  0x40   :  { %122 = vsyncpa [#allocation10], 1 }

</bundles_post_ra>
